<compile_context>
chip_gen: v6e
topology: v6e:2x2x1
jax: 0.10.0
libtpu: 0.0.40
codegen_flags: <defaults>
</compile_context>

<pallas_src>
import functools
import math

import jax
import jax.numpy as jnp
from jax.experimental import pallas as pl
from jax.experimental.pallas import tpu as pltpu

_VMEM = pl.BlockSpec(memory_space=pltpu.MemorySpace.VMEM)
_NEG_BIG = -9.0e15


# ---------------------------------------------------------------------------
# In-kernel helpers (pure jnp, traced inside the Pallas kernel bodies)
# ---------------------------------------------------------------------------
def _elu(x):
    return jnp.where(x > 0, x, jnp.exp(x) - 1.0)


def _leaky_relu(x, alpha):
    return jnp.where(x > 0, x, alpha * x)


def _round_up(v, m):
    return ((v + m - 1) // m) * m


# ---------------------------------------------------------------------------
# Generation-aware knobs
# ---------------------------------------------------------------------------
def _device_kind():
    try:
        return jax.devices()[0].device_kind.lower()
    except Exception:
        return ""


def _vmem_capacity_bytes(kind):
    try:
        cap = getattr(pltpu.get_tpu_info(), "vmem_capacity_bytes", None)
        if cap:
            return int(cap)
    except Exception:
        pass
    return (64 << 20) if "v7" in kind else (128 << 20)


def _mosaic_params(step_bytes, vmem_cap, parallel_axes=0):
    # v7x has 64 MiB physical VMEM per TensorCore -> tighter cap; v5e/v6e can go high.
    cap = (48 << 20) if vmem_cap <= (64 << 20) else (112 << 20)
    limit = int(min(max(int(step_bytes) + (8 << 20), 32 << 20), cap))
    if parallel_axes:
        return pltpu.CompilerParams(
            dimension_semantics=("parallel",) * parallel_axes,
            vmem_limit_bytes=limit)
    return pltpu.CompilerParams(vmem_limit_bytes=limit)


# ---------------------------------------------------------------------------
# Kernel A: ELU + GroupNorm(1 group, whole tensor, unbiased var) + fused
# projections.  Outputs:
#   hvals bf16 [Np, 2*fp]  = [ zn@We | pad | zn@Wx2 | pad ]   (lane-dense)
#   hatt  f32  [Np, 8]     = [ he.ae1, he.ae2, hx.ax1, hx.ax2, 0.. ]
# Padded rows (>= n_valid) are excluded from the normalization statistics.
# ---------------------------------------------------------------------------
def prep_kernel(z_ref, gn_w_ref, gn_b_ref, w_vals_ref, w_att_ref,
                hvals_ref, hatt_ref, *, eps, n_valid):
    z = _elu(z_ref[...])                                       # [Np, fin] f32
    rows = jax.lax.broadcasted_iota(jnp.int32, z.shape, 0)
    valid = rows < n_valid
    n_elem = n_valid * z.shape[1]
    zv = jnp.where(valid, z, 0.0)
    mean = jnp.sum(zv, keepdims=True) / n_elem
    # unbiased variance /(n-1) matches the reference (torch.var default)
    var = jnp.sum(jnp.where(valid, (z - mean) ** 2, 0.0),
                  keepdims=True) / (n_elem - 1)
    zn = (z - mean) * jax.lax.rsqrt(var + eps)
    zn = zn * gn_w_ref[...] + gn_b_ref[...]
    zb = zn.astype(jnp.bfloat16)
    hvals_ref[...] = jnp.dot(zb, w_vals_ref[...],
                             preferred_element_type=jnp.float32
                             ).astype(jnp.bfloat16)
    hatt_ref[...] = jnp.dot(zb, w_att_ref[...],
                            preferred_element_type=jnp.float32)


# ---------------------------------------------------------------------------
# Kernel B: FUSED first-layer attention (edge branch + x branch layer 2).
# One adjacency row-block is streamed once and reused by both branches.
#   oute bf16 [tq, fp]  = elu(softmax_e @ he_pad)                  (-> gram)
#   outx bf16 [tq, w3w] = tanh(elu(softmax_x @ hx_pad)) @ W3_aug   (-> layer 3)
#     outx cols: [ h3 (f3) | h3.ax31 | h3.ax32 | zeros ]
# ---------------------------------------------------------------------------
def gat_layer1_kernel(f1e_ref, f2e_ref, f1x_ref, f2x_ref, adj_ref,
                      hvals_ref, w3_ref, oute_ref, outx_ref,
                      *, alpha, fp, use_bf16_exp):
    # int8 adjacency -> f32 once; reused as the mask by both branches.
    adjf = adj_ref[...].astype(jnp.float32)                    # [tq, Np]

    # TODO(synk): F.dropout(attention, 0.6) is the identity at inference time.
    def attend(f1, f2):
        e = _leaky_relu(f1 + f2, alpha)                        # [tq, Np]
        e = jnp.where(adjf > 0.0, e, _NEG_BIG)
        m = jnp.max(e, axis=1, keepdims=True)
        d = e - m
        if use_bf16_exp:                                       # v6e/v7x: bf16 EUP exp
            p = jnp.exp(d.astype(jnp.bfloat16)).astype(jnp.float32)
        else:                                                  # v5e: f32-only EUP
            p = jnp.exp(d)
        s = jnp.sum(p, axis=1, keepdims=True)
        # exact reciprocal: only [tq,1] values, nearly free, no approx error.
        return (p * (1.0 / s)).astype(jnp.bfloat16)

    att_e = attend(f1e_ref[...], f2e_ref[...])
    att_x = attend(f1x_ref[...], f2x_ref[...])

    re = jnp.dot(att_e, hvals_ref[:, :fp],
                 preferred_element_type=jnp.float32)           # [tq, fp]
    oute_ref[...] = _elu(re).astype(jnp.bfloat16)

    hx = jnp.dot(att_x, hvals_ref[:, fp:],
                 preferred_element_type=jnp.float32)           # [tq, fp]
    hx = jnp.tanh(_elu(hx)).astype(jnp.bfloat16)
    outx_ref[...] = jnp.dot(hx, w3_ref[...],
                            preferred_element_type=jnp.float32
                            ).astype(jnp.bfloat16)


# ---------------------------------------------------------------------------
# Kernel C: layer-3 attention (concat=False) fused with the collapsed
# dlinear1@dlinear2 projection.  Output f32 [tq, out_w] (lane-dense).
# ---------------------------------------------------------------------------
def gat_layer3_kernel(f1_ref, f2_ref, adj_ref, hv_ref, w12_ref, b12_ref,
                      out_ref, *, alpha, use_bf16_exp):
    adjf = adj_ref[...].astype(jnp.float32)
    e = _leaky_relu(f1_ref[...] + f2_ref[...], alpha)
    e = jnp.where(adjf > 0.0, e, _NEG_BIG)
    m = jnp.max(e, axis=1, keepdims=True)
    d = e - m
    if use_bf16_exp:
        p = jnp.exp(d.astype(jnp.bfloat16)).astype(jnp.float32)
    else:
        p = jnp.exp(d)
    s = jnp.sum(p, axis=1, keepdims=True)
    att = (p * (1.0 / s)).astype(jnp.bfloat16)
    hp = jnp.dot(att, hv_ref[...], preferred_element_type=jnp.float32)
    # concat=False -> no ELU; w12 rows beyond f3 are zero so the f13/f23
    # columns carried inside hv never contaminate the result.
    out_ref[...] = jnp.dot(hp.astype(jnp.bfloat16), w12_ref[...],
                           preferred_element_type=jnp.float32) + b12_ref[...]


# ---------------------------------------------------------------------------
# Kernel D: recon_edge gram + sigmoid.  RHS is pre-transposed on the host so
# this is a plain [tq,fp] @ [fp,N] MXU matmul (no in-kernel transpose).
# NOTE: output kept f32 because it is the module's final return value.
# ---------------------------------------------------------------------------
def gram_kernel(re_ref, ret_ref, out_ref):
    g = jnp.dot(re_ref[...], ret_ref[...],
                preferred_element_type=jnp.float32)            # [tq, Np]
    out_ref[...] = pl.reciprocal(1.0 + jnp.exp(-g), approx=True)


# ---------------------------------------------------------------------------
# Decoder forward (host wrapper)
# ---------------------------------------------------------------------------
def decoder_forward(z, adj, params, *, alpha=0.2, eps=1e-5, block_rows=None):
    n, fin = z.shape
    f = params["We"].shape[1]              # conv_ch
    f3 = params["Wx3"].shape[1]            # 64
    in_ch = params["dl2_w"].shape[1]

    kind = _device_kind()
    vmem_cap = _vmem_capacity_bytes(kind)
    use_bf16_exp = ("v6" in kind) or ("v7" in kind)   # v5e EUP is f32-only

    if block_rows is None:
        block_rows = 128 if vmem_cap <= (64 << 20) else 512

    # ---- padded, lane-dense sizes --------------------------------------
    tq = min(block_rows, _round_up(n, 8))
    tq = max(8, (tq // 8) * 8)
    n_pad = _round_up(n, tq)
    nb = n_pad // tq
    fp = _round_up(f, 128)                 # per-branch value-slab width
    wide = 2 * fp                          # [he | hx] slab width
    w3w = _round_up(f3 + 2, 128)           # [h3 | f13 | f23 | 0..]
    out_w = _round_up(in_ch, 128)

    f32, bf16 = jnp.float32, jnp.bfloat16

    # ---- host-side parameter folding (tiny f32 matmuls, done once) ------
    wae1 = params["We"] @ params["ae1"].T
    wae2 = params["We"] @ params["ae2"].T
    wax1 = params["Wx2"] @ params["ax21"].T
    wax2 = params["Wx2"] @ params["ax22"].T
    w_vals = jnp.zeros((fin, wide), f32)
    w_vals = w_vals.at[:, :f].set(params["We"]).at[:, fp:fp + f].set(params["Wx2"])
    w_vals = w_vals.astype(bf16)                                   # [fin, 2*fp]
    w_att = jnp.concatenate(
        [wae1, wae2, wax1, wax2, jnp.zeros((fin, 4), f32)], axis=1).astype(bf16)

    wa31 = params["Wx3"] @ params["ax31"].T
    wa32 = params["Wx3"] @ params["ax32"].T
    w3p = jnp.zeros((fp, w3w), f32)
    w3p = w3p.at[:f, :f3].set(params["Wx3"])
    w3p = w3p.at[:f, f3:f3 + 1].set(wa31).at[:f, f3 + 1:f3 + 2].set(wa32)
    w3p = w3p.astype(bf16)

    w12 = params["dl1_w"] @ params["dl2_w"]        # collapsed linears
    b12 = params["dl1_b"] @ params["dl2_w"] + params["dl2_b"]
    w12p = jnp.zeros((w3w, out_w), f32).at[:f3, :in_ch].set(w12).astype(bf16)
    b12p = jnp.zeros((1, out_w), f32).at[:, :in_ch].set(b12)

    # int8 adjacency (dominant HBM stream); padded keys stay 0 -> masked out.
    adj_i8 = jnp.zeros((n_pad, n_pad), jnp.int8).at[:n, :n].set(
        (adj > 0).astype(jnp.int8))
    z_p = jnp.zeros((n_pad, fin), f32).at[:n, :].set(z.astype(f32))

    # ---- kernel A: elu + groupnorm + fused projections -------------------
    hvals, hatt = pl.pallas_call(
        functools.partial(prep_kernel, eps=eps, n_valid=n),
        out_shape=(jax.ShapeDtypeStruct((n_pad, wide), bf16),
                   jax.ShapeDtypeStruct((n_pad, 8), f32)),
        in_specs=[_VMEM] * 5,
        out_specs=(_VMEM, _VMEM),
        compiler_params=_mosaic_params(
            n_pad * fin * 4 + fin * (wide + 8) * 2
            + n_pad * (wide * 2 + 32), vmem_cap),
        cost_estimate=pl.CostEstimate(
            flops=int(2 * n_pad * fin * (wide + 8) + 8 * n_pad * fin),
            transcendentals=int(n_pad * fin),
            bytes_accessed=int(n_pad * fin * 4 + n_pad * (wide * 2 + 32))),
    )(z_p, params["gn_w"], params["gn_b"], w_vals, w_att)

    # tiny host slices of the [Np, 8] attention-feature slab
    f1e = hatt[:, 0:1]
    f2e = hatt[:, 1:2].T
    f1x = hatt[:, 2:3]
    f2x = hatt[:, 3:4].T

    # ---- kernel B: fused first-layer attention (edge + x branch) ---------
    step_b = (2 * tq * n_pad                       # int8 adj (double buffered)
              + 2 * n_pad * 4 * 2 + 2 * tq * 4 * 2
              + n_pad * wide * 2 + fp * w3w * 2
              + 2 * (tq * fp * 2 + tq * w3w * 2)
              + 6 * tq * n_pad * 4)                # softmax temporaries (2 branches)
    oute, outx = pl.pallas_call(
        functools.partial(gat_layer1_kernel, alpha=alpha, fp=fp,
                          use_bf16_exp=use_bf16_exp),
        out_shape=(jax.ShapeDtypeStruct((n_pad, fp), bf16),
                   jax.ShapeDtypeStruct((n_pad, w3w), bf16)),
        grid=(nb,),
        in_specs=[
            pl.BlockSpec((tq, 1), lambda i: (i, 0)),         # f1 edge
            pl.BlockSpec((1, n_pad), lambda i: (0, 0)),      # f2 edge
            pl.BlockSpec((tq, 1), lambda i: (i, 0)),         # f1 x-branch
            pl.BlockSpec((1, n_pad), lambda i: (0, 0)),      # f2 x-branch
            pl.BlockSpec((tq, n_pad), lambda i: (i, 0)),     # int8 adjacency rows
            pl.BlockSpec((n_pad, wide), lambda i: (0, 0)),   # [he|hx] value slab
            pl.BlockSpec((fp, w3w), lambda i: (0, 0)),       # fused Wx3|a31|a32
        ],
        out_specs=(pl.BlockSpec((tq, fp), lambda i: (i, 0)),
                   pl.BlockSpec((tq, w3w), lambda i: (i, 0))),
        compiler_params=_mosaic_params(step_b, vmem_cap, parallel_axes=1),
        cost_estimate=pl.CostEstimate(
            flops=int(4 * n_pad * n_pad * fp + 2 * n_pad * fp * w3w
                      + 16 * n_pad * n_pad),
            transcendentals=int(2 * n_pad * n_pad + 2 * n_pad * fp),
            bytes_accessed=int(n_pad * n_pad + n_pad * wide * 2
                               + n_pad * (fp + w3w) * 2 + n_pad * 40)),
    )(f1e, f2e, f1x, f2x, adj_i8, hvals, w3p)

    # ---- kernel C: layer-3 attention + collapsed dlinear1@dlinear2 -------
    f13 = outx[:, f3:f3 + 1].astype(f32)            # [Np, 1]
    f23 = outx[:, f3 + 1:f3 + 2].astype(f32).T      # [1, Np]

    step_c = (2 * tq * n_pad + n_pad * 4 + tq * 4 * 2
              + n_pad * w3w * 2 + w3w * out_w * 2 + out_w * 4
              + 2 * tq * out_w * 4 + 4 * tq * n_pad * 4)
    x_pad = pl.pallas_call(
        functools.partial(gat_layer3_kernel, alpha=alpha,
                          use_bf16_exp=use_bf16_exp),
        out_shape=jax.ShapeDtypeStruct((n_pad, out_w), f32),
        grid=(nb,),
        in_specs=[
            pl.BlockSpec((tq, 1), lambda i: (i, 0)),
            pl.BlockSpec((1, n_pad), lambda i: (0, 0)),
            pl.BlockSpec((tq, n_pad), lambda i: (i, 0)),     # int8 adjacency rows
            pl.BlockSpec((n_pad, w3w), lambda i: (0, 0)),    # h3 value slab (bf16)
            pl.BlockSpec((w3w, out_w), lambda i: (0, 0)),
            pl.BlockSpec((1, out_w), lambda i: (0, 0)),
        ],
        out_specs=pl.BlockSpec((tq, out_w), lambda i: (i, 0)),
        compiler_params=_mosaic_params(step_c, vmem_cap, parallel_axes=1),
        cost_estimate=pl.CostEstimate(
            flops=int(2 * n_pad * n_pad * w3w + 2 * n_pad * w3w * out_w
                      + 8 * n_pad * n_pad),
            transcendentals=int(n_pad * n_pad),
            bytes_accessed=int(n_pad * n_pad + n_pad * w3w * 2
                               + n_pad * out_w * 4 + n_pad * 8)),
    )(f13, f23, adj_i8, outx, w12p, b12p)

    # ---- kernel D: sigmoid gram of the edge-branch output ----------------
    ret = oute.T                                    # [fp, Np] bf16 (host transpose once)
    step_d = 2 * tq * fp * 2 + fp * n_pad * 2 + 2 * tq * n_pad * 4 + tq * n_pad * 4
    recon_pad = pl.pallas_call(
        gram_kernel,
        out_shape=jax.ShapeDtypeStruct((n_pad, n_pad), f32),
        grid=(nb,),
        in_specs=[pl.BlockSpec((tq, fp), lambda i: (i, 0)),
                  pl.BlockSpec((fp, n_pad), lambda i: (0, 0))],
        out_specs=pl.BlockSpec((tq, n_pad), lambda i: (i, 0)),
        compiler_params=_mosaic_params(step_d, vmem_cap, parallel_axes=1),
        cost_estimate=pl.CostEstimate(
            flops=int(2 * n_pad * n_pad * fp),
            transcendentals=int(n_pad * n_pad),
            bytes_accessed=int(2 * n_pad * fp * 2 + n_pad * n_pad * 4)),
    )(oute, ret)

    recon = recon_pad[:n, :n]
    x = x_pad[:n, :in_ch]
    return recon, x


# ---------------------------------------------------------------------------
# Pure-JAX reference (mirrors the PyTorch forward) for validation
# ---------------------------------------------------------------------------
def _ref_gat(h_in, adj, W, a1, a2, alpha, concat):
    h = h_in @ W
    e = _leaky_relu(jnp.sum(h * a1, axis=1, keepdims=True)
                    + jnp.sum(h * a2, axis=1)[None, :], alpha)
    e = jnp.where(adj > 0, e, -9.0e15)
    att = jax.nn.softmax(e, axis=1)
    hp = att @ h
    return _elu(hp) if concat else hp


def decoder_reference(z, adj, params, *, alpha=0.2, eps=1e-5):
    z = _elu(z)
    n = z.size
    mean = jnp.mean(z)
    var = jnp.sum((z - mean) ** 2) / (n - 1)
    z = (z - mean) / jnp.sqrt(var + eps) * params["gn_w"] + params["gn_b"]
    re = _ref_gat(z, adj, params["We"], params["ae1"], params["ae2"], alpha, True)
    recon = jax.nn.sigmoid(re @ re.T)
    x = jnp.tanh(_ref_gat(z, adj, params["Wx2"], params["ax21"], params["ax22"], alpha, True))
    x = _ref_gat(x, adj, params["Wx3"], params["ax31"], params["ax32"], alpha, False)
    x = x @ params["dl1_w"] + params["dl1_b"]
    x = x @ params["dl2_w"] + params["dl2_b"]
    return recon, x


# ---------------------------------------------------------------------------
# Parameter construction (deterministic, mimics reset_parameters uniform init)
# ---------------------------------------------------------------------------
def make_params(key, in_channels, conv_ch):
    fh = conv_ch // 2
    ks = jax.random.split(key, 16)

    def u(k, shape, fan_in):
        s = 1.0 / math.sqrt(fan_in)
        return jax.random.uniform(k, shape, jnp.float32, -s, s)

    return {
        "gn_w": jnp.ones((1, fh), jnp.float32),
        "gn_b": jnp.zeros((1, fh), jnp.float32),
        "We": u(ks[0], (fh, conv_ch), fh),
        "ae1": u(ks[1], (1, conv_ch), fh),
        "ae2": u(ks[2], (1, conv_ch), fh),
        "Wx2": u(ks[3], (fh, conv_ch), fh),
        "ax21": u(ks[4], (1, conv_ch), fh),
        "ax22": u(ks[5], (1, conv_ch), fh),
        "Wx3": u(ks[6], (conv_ch, 64), conv_ch),
        "ax31": u(ks[7], (1, 64), conv_ch),
        "ax32": u(ks[8], (1, 64), conv_ch),
        "dl1_w": u(ks[9], (64, 64), 64),
        "dl1_b": u(ks[10], (1, 64), 64),
        "dl2_w": u(ks[11], (64, in_channels), 64),
        "dl2_b": u(ks[12], (1, in_channels), 64),
    }


if __name__ == "__main__":
    key = jax.random.PRNGKey(0)
    k_z, k_adj, k_p = jax.random.split(key, 3)

    N = 8            # number of graph nodes
    in_channels = 4  # reconstructed node-feature dim
    conv_ch = 32     # decoder latent dim (z has conv_ch // 2 = 16 features)

    z = jax.random.normal(k_z, (N, conv_ch // 2), jnp.float32)
    adj = (jax.random.uniform(k_adj, (N, N)) > 0.5).astype(jnp.float32)
    adj = jnp.maximum(adj, jnp.eye(N, dtype=jnp.float32))   # self-loops

    params = make_params(k_p, in_channels, conv_ch)

    recon_edge, x_rec = decoder_forward(z, adj, params)
    jax.block_until_ready((recon_edge, x_rec))

    # validate against the pure-f32 reference (bf16 MXU feeds -> looser tol)
    ref_recon, ref_x = decoder_reference(z, adj, params)
    assert recon_edge.shape == (N, N) and x_rec.shape == (N, in_channels)
    assert jnp.allclose(recon_edge, ref_recon, atol=5e-2, rtol=5e-2)
    assert jnp.allclose(x_rec, ref_x, atol=5e-2, rtol=5e-2)

    print("KERNEL_OK")
</pallas_src>

<mosaic_0001>
module attributes {stable_mosaic.version = 11 : i64} {
  func.func @prep_kernel(%arg0: memref<8x16xf32, #tpu.memory_space<vmem>>, %arg1: memref<1x16xf32, #tpu.memory_space<vmem>>, %arg2: memref<1x16xf32, #tpu.memory_space<vmem>>, %arg3: memref<16x256xbf16, #tpu.memory_space<vmem>>, %arg4: memref<16x8xbf16, #tpu.memory_space<vmem>>, %arg5: memref<8x256xbf16, #tpu.memory_space<vmem>>, %arg6: memref<8x8xf32, #tpu.memory_space<vmem>>) attributes {dimension_semantics = [], scalar_prefetch = 0 : i64, scratch_operands = 0 : i64, tpu.core_type = #tpu.core_type<tc>} {
    %c0 = arith.constant 0 : index
    %c0_0 = arith.constant 0 : index
    %0 = vector.load %arg0[%c0, %c0_0] : memref<8x16xf32, #tpu.memory_space<vmem>>, vector<8x16xf32>
    %cst = arith.constant 0.000000e+00 : f32
    %1 = vector.broadcast %cst : f32 to vector<8x16xf32>
    %2 = arith.cmpf ogt, %0, %1 : vector<8x16xf32>
    %3 = math.exp %0 : vector<8x16xf32>
    %cst_1 = arith.constant 1.000000e+00 : f32
    %4 = vector.broadcast %cst_1 : f32 to vector<8x16xf32>
    %5 = arith.subf %3, %4 : vector<8x16xf32>
    %6 = arith.select %2, %0, %5 : vector<8x16xi1>, vector<8x16xf32>
    %7 = tpu.iota {dimensions = array<i32: 0>} : vector<8x16xi32>
    %c8_i32 = arith.constant 8 : i32
    %8 = vector.broadcast %c8_i32 : i32 to vector<8x16xi32>
    %9 = arith.cmpi slt, %7, %8 : vector<8x16xi32>
    %cst_2 = arith.constant 0.000000e+00 : f32
    %10 = vector.broadcast %cst_2 : f32 to vector<8x16xf32>
    %11 = arith.select %9, %6, %10 : vector<8x16xi1>, vector<8x16xf32>
    %12 = vector.shape_cast %11 : vector<8x16xf32> to vector<1x8x16xf32>
    %cst_3 = arith.constant dense<0.000000e+00> : vector<1xf32>
    %13 = vector.multi_reduction <add>, %12, %cst_3 [1, 2] : vector<1x8x16xf32> to vector<1xf32>
    %14 = vector.shape_cast %13 : vector<1xf32> to vector<1x1x1xf32>
    %15 = vector.extract %14[0, 0, 0] : f32 from vector<1x1x1xf32>
    %16 = vector.broadcast %15 : f32 to vector<1x1xf32>
    %cst_4 = arith.constant 1.280000e+02 : f32
    %17 = vector.broadcast %cst_4 : f32 to vector<1x1xf32>
    %18 = arith.divf %16, %17 : vector<1x1xf32>
    %19 = vector.broadcast %18 : vector<1x1xf32> to vector<8x16xf32>
    %20 = arith.subf %6, %19 : vector<8x16xf32>
    %21 = arith.mulf %20, %20 : vector<8x16xf32>
    %cst_5 = arith.constant 0.000000e+00 : f32
    %22 = vector.broadcast %cst_5 : f32 to vector<8x16xf32>
    %23 = arith.select %9, %21, %22 : vector<8x16xi1>, vector<8x16xf32>
    %24 = vector.shape_cast %23 : vector<8x16xf32> to vector<1x8x16xf32>
    %cst_6 = arith.constant dense<0.000000e+00> : vector<1xf32>
    %25 = vector.multi_reduction <add>, %24, %cst_6 [1, 2] : vector<1x8x16xf32> to vector<1xf32>
    %26 = vector.shape_cast %25 : vector<1xf32> to vector<1x1x1xf32>
    %27 = vector.extract %26[0, 0, 0] : f32 from vector<1x1x1xf32>
    %28 = vector.broadcast %27 : f32 to vector<1x1xf32>
    %cst_7 = arith.constant 1.270000e+02 : f32
    %29 = vector.broadcast %cst_7 : f32 to vector<1x1xf32>
    %30 = arith.divf %28, %29 : vector<1x1xf32>
    %31 = vector.broadcast %18 : vector<1x1xf32> to vector<8x16xf32>
    %32 = arith.subf %6, %31 : vector<8x16xf32>
    %cst_8 = arith.constant 9.99999974E-6 : f32
    %33 = vector.broadcast %cst_8 : f32 to vector<1x1xf32>
    %34 = arith.addf %30, %33 : vector<1x1xf32>
    %35 = math.rsqrt %34 : vector<1x1xf32>
    %36 = vector.broadcast %35 : vector<1x1xf32> to vector<8x16xf32>
    %37 = arith.mulf %32, %36 : vector<8x16xf32>
    %c0_9 = arith.constant 0 : index
    %c0_10 = arith.constant 0 : index
    %38 = vector.load %arg1[%c0_9, %c0_10] : memref<1x16xf32, #tpu.memory_space<vmem>>, vector<1x16xf32>
    %39 = vector.broadcast %38 : vector<1x16xf32> to vector<8x16xf32>
    %40 = arith.mulf %37, %39 : vector<8x16xf32>
    %c0_11 = arith.constant 0 : index
    %c0_12 = arith.constant 0 : index
    %41 = vector.load %arg2[%c0_11, %c0_12] : memref<1x16xf32, #tpu.memory_space<vmem>>, vector<1x16xf32>
    %42 = vector.broadcast %41 : vector<1x16xf32> to vector<8x16xf32>
    %43 = arith.addf %40, %42 : vector<8x16xf32>
    %44 = arith.truncf %43 : vector<8x16xf32> to vector<8x16xbf16>
    %c0_13 = arith.constant 0 : index
    %c0_14 = arith.constant 0 : index
    %45 = vector.load %arg3[%c0_13, %c0_14] : memref<16x256xbf16, #tpu.memory_space<vmem>>, vector<16x256xbf16>
    %cst_15 = arith.constant dense<0.000000e+00> : vector<8x256xf32>
    %46 = tpu.matmul %44, %45, %cst_15 {dimension_numbers = #tpu.dot_dimension_numbers<[1], [0], [0], [1], [0, 0, 1, 1], [], []>} : vector<8x16xbf16>, vector<16x256xbf16>, vector<8x256xf32> -> vector<8x256xf32>
    %47 = arith.truncf %46 : vector<8x256xf32> to vector<8x256xbf16>
    %c0_16 = arith.constant 0 : index
    %c0_17 = arith.constant 0 : index
    %48 = vector.load %arg5[%c0_16, %c0_17] : memref<8x256xbf16, #tpu.memory_space<vmem>>, vector<8x256xbf16>
    tpu.vector_store %arg5[%c0_16, %c0_17], %47 {strides = array<i32>} : memref<8x256xbf16, #tpu.memory_space<vmem>>, vector<8x256xbf16>,
    %c0_18 = arith.constant 0 : index
    %c0_19 = arith.constant 0 : index
    %49 = vector.load %arg4[%c0_18, %c0_19] : memref<16x8xbf16, #tpu.memory_space<vmem>>, vector<16x8xbf16>
    %cst_20 = arith.constant dense<0.000000e+00> : vector<8x8xf32>
    %50 = tpu.matmul %44, %49, %cst_20 {dimension_numbers = #tpu.dot_dimension_numbers<[1], [0], [0], [1], [0, 0, 1, 1], [], []>} : vector<8x16xbf16>, vector<16x8xbf16>, vector<8x8xf32> -> vector<8x8xf32>
    %c0_21 = arith.constant 0 : index
    %c0_22 = arith.constant 0 : index
    %51 = vector.load %arg6[%c0_21, %c0_22] : memref<8x8xf32, #tpu.memory_space<vmem>>, vector<8x8xf32>
    tpu.vector_store %arg6[%c0_21, %c0_22], %50 {strides = array<i32>} : memref<8x8xf32, #tpu.memory_space<vmem>>, vector<8x8xf32>,
    return
  }
}

</mosaic_0001>

<bundles_post_ra>
// kernel: tpu_custom_call.1
= control target key start
LH: loop header
LB: loop body
LE: loop exit
PB: predicated region body
PF: predicated region fallthrough
CT: control target
= control target key end

     0   :  { %12 = vsyncpa [#allocation3], 0  ;;  %s449_s0 = inlined_call_operand.hbm [shape: f32[8,16], index: 0, kind: input, shape index: {}]   ;;  %s450_s1 = inlined_call_operand.vmem [shape: f32[1,16], index: 1, kind: input, shape index: {}]   ;;  %s451_s2 = inlined_call_operand.hbm [shape: f32[1,16], index: 2, kind: input, shape index: {}]   ;;  %s452_s3 = inlined_call_operand.vmem [shape: bf16[16,256], index: 3, kind: input, shape index: {}]   ;;  %s453_s4 = inlined_call_operand.vmem [shape: bf16[16,8], index: 4, kind: input, shape index: {}]   ;;  %s454_s5 = inlined_call_operand.hbm [shape: bf16[8,256], index: 5, kind: output, shape index: {0}]   ;;  %s455_s6 = inlined_call_operand.hbm [shape: f32[8,8], index: 6, kind: output, shape index: {1}]  }
   0x1   :  { %13 = vsyncpa [#allocation6], 0 }
   0x2   :  { %14 = vsyncpa [#allocation4], 0 }
   0x3   :  { %15 = vsyncpa [#allocation9], 0  ;;  %s379_s21 = smov [#allocation2]   ;;  %s380_s23 = smov [#allocation5]  }
   0x4   :  { %s22_s22 = sshll.u32 %s379_s21, 4  ;;  %s34_s24 = sshll.u32 %s380_s23, 4  ;;  %s23_s22 = int_to_ptr.vmem [resolvable:$true] %s22_s22  ;;  %s35_s24 = int_to_ptr.vmem [resolvable:$true] %s34_s24 }
   0x5   :  { %s299_s25 = scalar_lea.vmem %s23_s22, 128  ;;  %p304_p1 = scmp.lt.s32.totalorder %s23_s22, %s23_s22 }
   0x6   :  { %p300_p0 = scmp.ne.s32.totalorder %s23_s22, %s299_s25  ;;  %p305_p2 = scmp.lt.s32.totalorder %s299_s25, %s299_s25 }
   0x8   :  { %p306_p3 = por %p305_p2, %p304_p1 }
   0xa   :  { %p307_p4 = pnand %p306_p3, %p300_p0 }
   0xc   :  { %310 = shalt.err (!%p307_p4)
}
   0xd   :  { %25 = dma.hbm_to_vmem [thread:$0]  %s449_s0, 128, %s23_s22, [#allocation3]  }
   0xe   :  { %s319_s28 = scalar_lea.vmem %s35_s24, 16  ;;  %s323_s29 = scalar_lea.vmem %s35_s24, 32 }
   0xf   :  { %p320_p5 = scmp.ne.s32.totalorder %s35_s24, %s319_s28  ;;  %p324_p6 = scmp.lt.s32.totalorder %s35_s24, %s35_s24 }
  0x10   :  { %p325_p7 = scmp.lt.s32.totalorder %s323_s29, %s319_s28 }
  0x12   :  { %p326_p8 = por %p325_p7, %p324_p6 }
  0x14   :  { %p327_p9 = pnand %p326_p8, %p320_p5 }
  0x16   :  { %330 = shalt.err (!%p327_p9)
}
  0x17   :  { %37 = dma.hbm_to_vmem [thread:$0]  %s451_s2, 16, %s35_s24, [#allocation6]  }
  0x18   :  { %371 = dma.done.wait [#allocation3], 128  }
  0x19   :  { %372 = vsyncadd [#allocation3], 4294967168 }
  0x1a   :  { %373 = dma.done.wait [#allocation6], 16  }
  0x1b   :  { %374 = vsyncadd [#allocation6], 4294967280  ;;  %v49_v0 = vld [vmem:[#allocation2] sm:$0xff]  ;;  %vm59_vm1 = vcmask 130048   ;;  %v381_v21 = vmov 0.0   ;;  %v382_v22 = vmov 0  }
  0x1c   :  { %v51_v1 = vmul.f32 1.442695, %v49_v0  ;;  %vm50_vm0 = vcmp.gt.f32.partialorder %v49_v0, 0.0  ;;  %v283_v18 = vld [vmem:[%s452_s3 + $0x4] ss:$8 sps:$4 sm:$0xff]   ;;  %266 = vmatprep.subr.bf16.mxu1 %v381_v21  ;;  %156 = vmatprep.mubr.bf16.mxu0 %v382_v22  ;;  %vm383_vm2 = vmmov 0  }
  0x1d   :  { %v285_v19 = vld [vmem:[%s452_s3] ss:$8 sps:$4 sm:$0xff]   ;;  %138 = vmatprep.subr.bf16.mxu0 %v283_v18  ;;  %268 = vmatprep.mubr.msk.bf16.mxu1 %vm383_vm2, %v381_v21  ;;  %s384_s14 = smov [#allocation8]   ;;  %vm222_vm3 = vcmask 64512   ;;  %s385_s16 = smov [#allocation7]  }
  0x1e   :  { %287 = vpow2.f32 %v51_v1  ;;  %v286_v20 = vld [vmem:[%s453_s4] sm:$0xff]   ;;  %139 = vmatpush1.bf16.msra.mxu0 %v285_v19  ;;  %v256_v36 = vld [vmem:[#allocation5] ss:$0 sm:$0xff]  ;;  %s240_s15 = sshll.u32 %s384_s14, 4  ;;  %s230_s17 = sshll.u32 %s385_s16, 4  ;;  %s241_s15 = int_to_ptr.vmem [resolvable:$true] %s240_s15  ;;  %s231_s17 = int_to_ptr.vmem [resolvable:$true] %s230_s17 }
  0x1f   :  { %267 = vmatpush3.bf16.msra.mxu1 %v286_v20  ;;  %v255_v34 = vld [vmem:[%s450_s1] ss:$0 sm:$0xff]  ;;  %s331_s1 = scalar_lea.vmem %s241_s15, 128  ;;  %p336_p11 = scmp.lt.s32.totalorder %s241_s15, %s241_s15 }
  0x20   :  { %p332_p10 = scmp.ne.s32.totalorder %s241_s15, %s331_s1  ;;  %p337_p12 = scmp.lt.s32.totalorder %s331_s1, %s331_s1 }
  0x22   :  { %p338_p13 = por %p337_p12, %p336_p11 }
  0x24   :  { %p339_p0 = pnand %p338_p13, %p332_p10 }
  0x2b   :  { %v288_v2 = vpop.eup %287 }
  0x2c   :  { %v254_v3 = vadd.f32 -1.0, %v288_v2 }
  0x2e   :  { %v54_v4 = vsel %vm50_vm0, %v49_v0, %v254_v3 }
  0x2f   :  { %v60_v5 = vsel %vm59_vm1, %v54_v4, 0.0 }
  0x30   :  { %61 = vadd.xlane.f32.xlu0 %v60_v5 }
  0xb9   :  { %v62_v6 = vpop.xlane.xlu0 %61 }
  0xba   :  { %v63_v7 = vrot.slane %v62_v6, 4 }
  0xbc   :  { %v64_v8 = vadd.f32 %v63_v7, %v62_v6 }
  0xbe   :  { %v65_v9 = vrot.slane %v64_v8, 2 }
  0xc0   :  { %v66_v10 = vadd.f32 %v65_v9, %v64_v8 }
  0xc2   :  { %v67_v11 = vrot.slane %v66_v10, 1 }
  0xc4   :  { %v68_v12 = vadd.f32 %v67_v11, %v66_v10 }
  0xc6   :  { %272 = vpush %v68_v12 }
  0xf7   :  { %s273_s0 = spop %272 }
  0xf8   :  { %v70_v13 = vstv %s273_s0 }
  0xf9   :  { %v72_v14 = vmul.f32 0.0078125, %v70_v13 }
  0xfb   :  { %v73_v15 = vsub.f32 %v54_v4, %v72_v14 }
  0xfd   :  { %v74_v16 = vmul.f32 %v73_v15, %v73_v15 }
  0xff   :  { %v76_v17 = vsel %vm59_vm1, %v74_v16, 0.0 }
 0x100   :  { %77 = vadd.xlane.f32.xlu0 %v76_v17 }
 0x189   :  { %v78_v23 = vpop.xlane.xlu0 %77 }
 0x18a   :  { %v79_v24 = vrot.slane %v78_v23, 4 }
 0x18c   :  { %v80_v25 = vadd.f32 %v79_v24, %v78_v23 }
 0x18e   :  { %v81_v26 = vrot.slane %v80_v25, 2 }
 0x190   :  { %v82_v27 = vadd.f32 %v81_v26, %v80_v25 }
 0x192   :  { %v83_v28 = vrot.slane %v82_v27, 1 }
 0x194   :  { %v84_v29 = vadd.f32 %v83_v28, %v82_v27 }
 0x196   :  { %274 = vpush %v84_v29 }
 0x1c7   :  { %s275_s3 = spop %274 }
 0x1c8   :  { %v86_v30 = vstv %s275_s3 }
 0x1c9   :  { %v88_v31 = vmul.f32 0.007874016, %v86_v30 }
 0x1cb   :  { %v89_v32 = vadd.f32 1e-05, %v88_v31 }
 0x1cd   :  { %289 = vrsqrt.f32 %v89_v32 }
 0x1da   :  { %v290_v33 = vpop.eup %289 }
 0x1db   :  { %v91_v35 = vmul.f32 %v290_v33, %v73_v15 }
 0x1dd   :  { %v99_v37 = vmul.f32 %v255_v34, %v91_v35 }
 0x1df   :  { %v107_v38 = vadd.f32 %v256_v36, %v99_v37 }
 0x1e1   :  { %v108_v39 = vpack.c.bf16 %v107_v38, %v107_v38 }
 0x1e3   :  { %259 = vmatmul.mubr.msk.bf16.vlgmr.msra.gmra.mxu0 %vm59_vm1, %v108_v39  ;;  %269 = vmatmul.mubr.msk.bf16.vlgmr.msra.gmra.mxu1 %vm59_vm1, %v108_v39 }
 0x2a3   :  { %v158_v40 = vpop.f32.mrf.mxu0  ;;  %v216_v41 = vpop.f32.mrf.mxu1 }
 0x2a4   :  { %223 = vst.msk [vmem:[#allocation8] sm:$0xff] %vm222_vm3, %v216_v41 }
 0x2a5   :  { %v160_v42 = vpop.f32.mrf.mxu0  ;;  %v270_v43 = vpop.f32.mrf.mxu1 }
 0x2a6   :  { %342 = shalt.err (!%p339_p0)
}
 0x2a7   :  { %243 = dma.vmem_to_hbm [thread:$0]  %s241_s15, 128, %s455_s6, [#allocation9]   ;;  %v263_v44 = vpack.c.bf16 %v160_v42, %v158_v40  ;;  %v162_v45 = vpop.f32.mrf.mxu0  ;;  %v219_v46 = vpop.f32.mrf.mxu1 }
 0x2a8   :  { %s351_s20 = scalar_lea.vmem %s231_s17, 128  ;;  %p356_p2 = scmp.lt.s32.totalorder %s231_s17, %s231_s17 }
 0x2a9   :  { %173 = vst [vmem:[#allocation7] sm:$0xff] %v263_v44  ;;  %v163_v47 = vpop.f32.mrf.mxu0  ;;  %v271_v48 = vpop.f32.mrf.mxu1  ;;  %p352_p1 = scmp.ne.s32.totalorder %s231_s17, %s351_s20  ;;  %p357_p3 = scmp.lt.s32.totalorder %s351_s20, %s351_s20 }
 0x2ab   :  { %p358_p4 = por %p357_p3, %p356_p2 }
 0x2ad   :  { %p359_p5 = pnand %p358_p4, %p352_p1 }
 0x2af   :  { %362 = shalt.err (!%p359_p5)
}
 0x2b0   :  { %233 = dma.vmem_to_hbm [thread:$0]  %s231_s17, 128, %s454_s5, [#allocation4]  }
 0x2b1   :  { %375 = dma.done.wait [#allocation4], 128  }
 0x2b2   :  { %376 = vsyncadd [#allocation4], 4294967168 }
 0x2b3   :  { %377 = dma.done.wait [#allocation9], 128  }
 0x2b4   :  { %378 = vsyncadd [#allocation9], 4294967168 }
 0x2b5   :  { %250 = vsyncpa [#allocation3], 1 }
 0x2b6   :  { %251 = vsyncpa [#allocation6], 1 }
 0x2b7   :  { %252 = vsyncpa [#allocation4], 1 }
 0x2b8   :  { %253 = vsyncpa [#allocation9], 1 }

</bundles_post_ra>
